<compile_context>
chip_gen: v6e
topology: v6e:2x2x1
jax: 0.10.0
libtpu: 0.0.40
codegen_flags: <defaults>
</compile_context>

<pallas_src>
import functools

import jax
import jax.numpy as jnp
from jax.experimental import pallas as pl
from jax.experimental.pallas import tpu as pltpu

LANE = 128


def ffn_kernel(x_ref, w1_ref, b1_ref, w2_ref, b2_ref, w3_ref, b3_ref, o_ref):
    # fc1 + ReLU: matmul in compute dtype on the MXU, accumulate in f32,
    # bias-add / ReLU in f32 on the VPU.
    h1 = jnp.dot(x_ref[...], w1_ref[...], preferred_element_type=jnp.float32)
    h1 = jnp.maximum(h1 + b1_ref[...], 0.0)
    # fc2 + ReLU
    h2 = jnp.dot(h1.astype(w2_ref.dtype), w2_ref[...],
                 preferred_element_type=jnp.float32)
    h2 = jnp.maximum(h2 + b2_ref[...], 0.0)
    # fc3 (no activation); output width is zero-padded to 128 lanes.
    out = jnp.dot(h2.astype(w3_ref.dtype), w3_ref[...],
                  preferred_element_type=jnp.float32)
    o_ref[...] = (out + b3_ref[...]).astype(o_ref.dtype)


def _round_up(v, m):
    return ((v + m - 1) // m) * m


@functools.partial(jax.jit, static_argnames=("compute_dtype", "block_batch"))
def feedforward_nn(x, w1, b1, w2, b2, w3, b3,
                   compute_dtype=jnp.bfloat16, block_batch=256):
    """x: (B, input_dim) f32 -> (B, 3) f32."""
    B, D = x.shape
    H1 = w1.shape[1]       # 128
    H2 = w2.shape[1]       # 64
    out_dim = w3.shape[1]  # 3

    # Batch tile: multiple of 8 sublanes, capped at block_batch. Pad batch so
    # the grid covers it exactly (padded rows are sliced off at the end).
    TB = min(block_batch, _round_up(B, 8))
    B_pad = _round_up(B, TB)
    x_p = x if B_pad == B else jnp.zeros((B_pad, D), x.dtype).at[:B].set(x)

    # Lane-dense fc3: pad output width to a multiple of 128 lanes with zeros.
    out_pad = _round_up(max(out_dim, LANE), LANE)
    w3_p = jnp.zeros((H2, out_pad), w3.dtype).at[:, :out_dim].set(w3)
    b3_p = jnp.zeros((1, out_pad), b3.dtype).at[:, :out_dim].set(b3)

    # bf16 (or f32) MXU inputs; biases and accumulation stay f32.
    xc = x_p.astype(compute_dtype)
    w1c = w1.astype(compute_dtype)
    w2c = w2.astype(compute_dtype)
    w3c = w3_p.astype(compute_dtype)
    b1f = b1.astype(jnp.float32)
    b2f = b2.astype(jnp.float32)
    b3f = b3_p.astype(jnp.float32)

    grid = (B_pad // TB,)

    def const_spec(shape):
        # Weight/bias blocks are the full (small) array and never change with
        # the grid index -> they stay resident in VMEM, fetched once.
        return pl.BlockSpec(shape, lambda i: (0,) * len(shape))

    itemsize = jnp.dtype(compute_dtype).itemsize
    flops = 2 * B_pad * (D * H1 + H1 * H2 + H2 * out_pad)
    bytes_accessed = (
        B_pad * D * itemsize                                   # streamed x
        + (D * H1 + H1 * H2 + H2 * out_pad) * itemsize         # resident weights
        + (H1 + H2 + out_pad) * 4                              # biases (f32)
        + B_pad * out_pad * 4                                  # streamed output
    )

    out_p = pl.pallas_call(
        ffn_kernel,
        out_shape=jax.ShapeDtypeStruct((B_pad, out_pad), jnp.float32),
        grid=grid,
        in_specs=[
            pl.BlockSpec((TB, D), lambda i: (i, 0)),   # x: batch-tiled stream
            const_spec((D, H1)),                       # w1
            const_spec((1, H1)),                       # b1
            const_spec((H1, H2)),                      # w2
            const_spec((1, H2)),                       # b2
            const_spec((H2, out_pad)),                 # w3 (lane-padded)
            const_spec((1, out_pad)),                  # b3 (lane-padded)
        ],
        out_specs=pl.BlockSpec((TB, out_pad), lambda i: (i, 0)),
        compiler_params=pltpu.CompilerParams(
            dimension_semantics=("parallel",),          # shard batch over TCs (v7x)
            vmem_limit_bytes=32 * 1024 * 1024,          # safe on 64 MiB v7x VMEM
        ),
        cost_estimate=pl.CostEstimate(
            flops=flops, transcendentals=0, bytes_accessed=bytes_accessed),
    )(xc, w1c, b1f, w2c, b2f, w3c, b3f)

    # NOTE: K=32/K=64 contraction dims under-fill the MXU systolic depth; at
    # these model sizes the kernel is DMA/overhead-bound by construction.
    return out_p[:B, :out_dim]


def init_params(key, input_dim):
    """Deterministic init mimicking nn.Linear's U(-1/sqrt(fan_in), 1/sqrt(fan_in))."""
    dims = [(input_dim, 128), (128, 64), (64, 3)]
    params = []
    for fan_in, fan_out in dims:
        kw, kb, key = jax.random.split(key, 3)
        bound = 1.0 / (fan_in ** 0.5)
        w = jax.random.uniform(kw, (fan_in, fan_out), jnp.float32, -bound, bound)
        b = jax.random.uniform(kb, (1, fan_out), jnp.float32, -bound, bound)
        params += [w, b]
    return params


def reference(x, w1, b1, w2, b2, w3, b3):
    h1 = jnp.maximum(x @ w1 + b1, 0.0)
    h2 = jnp.maximum(h1 @ w2 + b2, 0.0)
    return h2 @ w3 + b3


if __name__ == "__main__":
    key = jax.random.PRNGKey(0)
    kx, kp = jax.random.split(key)

    batch = 8
    input_dim = 32

    x = jax.random.normal(kx, (batch, input_dim), jnp.float32)
    w1, b1, w2, b2, w3, b3 = init_params(kp, input_dim)
    ref = reference(x, w1, b1, w2, b2, w3, b3)

    # Exact-math check: f32 datapath must match the reference tightly.
    out_f32 = feedforward_nn(x, w1, b1, w2, b2, w3, b3,
                             compute_dtype=jnp.float32)
    out_f32 = jax.block_until_ready(out_f32)
    assert out_f32.shape == (batch, 3)
    assert jnp.allclose(out_f32, ref, atol=1e-5, rtol=1e-5), "f32 mismatch vs reference"

    # Default fast path: bf16 MXU inputs with f32 accumulation.
    out_bf16 = feedforward_nn(x, w1, b1, w2, b2, w3, b3)
    out_bf16 = jax.block_until_ready(out_bf16)
    assert out_bf16.shape == (batch, 3)
    assert jnp.allclose(out_bf16, ref, atol=5e-2, rtol=5e-2), "bf16 mismatch vs reference"

    print("KERNEL_OK")
</pallas_src>

<mosaic_0001>
module attributes {stable_mosaic.version = 11 : i64} {
  func.func @ffn_kernel(%arg0: i32, %arg1: memref<8x32xf32, #tpu.memory_space<vmem>>, %arg2: memref<32x128xf32, #tpu.memory_space<vmem>>, %arg3: memref<1x128xf32, #tpu.memory_space<vmem>>, %arg4: memref<128x64xf32, #tpu.memory_space<vmem>>, %arg5: memref<1x64xf32, #tpu.memory_space<vmem>>, %arg6: memref<64x128xf32, #tpu.memory_space<vmem>>, %arg7: memref<1x128xf32, #tpu.memory_space<vmem>>, %arg8: memref<8x128xf32, #tpu.memory_space<vmem>>) attributes {dimension_semantics = [#tpu.dimension_semantics<parallel>], iteration_bounds = array<i64: 1>, scalar_prefetch = 0 : i64, scratch_operands = 0 : i64, tpu.core_type = #tpu.core_type<tc>, window_params = [{transform_indices = @transform_0, window_bounds = array<i64: 8, 32>}, {pipeline_mode = #tpu.pipeline_mode<synchronous>, transform_indices = @transform_1, window_bounds = array<i64: 32, 128>}, {pipeline_mode = #tpu.pipeline_mode<synchronous>, transform_indices = @transform_2, window_bounds = array<i64: 1, 128>}, {pipeline_mode = #tpu.pipeline_mode<synchronous>, transform_indices = @transform_3, window_bounds = array<i64: 128, 64>}, {pipeline_mode = #tpu.pipeline_mode<synchronous>, transform_indices = @transform_4, window_bounds = array<i64: 1, 64>}, {pipeline_mode = #tpu.pipeline_mode<synchronous>, transform_indices = @transform_5, window_bounds = array<i64: 64, 128>}, {pipeline_mode = #tpu.pipeline_mode<synchronous>, transform_indices = @transform_6, window_bounds = array<i64: 1, 128>}, {transform_indices = @transform_7, window_bounds = array<i64: 8, 128>}]} {
    %c0 = arith.constant 0 : index
    %c0_0 = arith.constant 0 : index
    %0 = vector.load %arg1[%c0, %c0_0] : memref<8x32xf32, #tpu.memory_space<vmem>>, vector<8x32xf32>
    %c0_1 = arith.constant 0 : index
    %c0_2 = arith.constant 0 : index
    %1 = vector.load %arg2[%c0_1, %c0_2] : memref<32x128xf32, #tpu.memory_space<vmem>>, vector<32x128xf32>
    %cst = arith.constant dense<0.000000e+00> : vector<8x128xf32>
    %2 = tpu.matmul %0, %1, %cst {dimension_numbers = #tpu.dot_dimension_numbers<[1], [0], [0], [1], [0, 0, 1, 1], [], []>} : vector<8x32xf32>, vector<32x128xf32>, vector<8x128xf32> -> vector<8x128xf32>
    %c0_3 = arith.constant 0 : index
    %c0_4 = arith.constant 0 : index
    %3 = vector.load %arg3[%c0_3, %c0_4] : memref<1x128xf32, #tpu.memory_space<vmem>>, vector<1x128xf32>
    %4 = vector.broadcast %3 : vector<1x128xf32> to vector<8x128xf32>
    %5 = arith.addf %2, %4 : vector<8x128xf32>
    %cst_5 = arith.constant 0.000000e+00 : f32
    %6 = vector.broadcast %cst_5 : f32 to vector<8x128xf32>
    %7 = arith.maximumf %5, %6 : vector<8x128xf32>
    %c0_6 = arith.constant 0 : index
    %c0_7 = arith.constant 0 : index
    %8 = vector.load %arg4[%c0_6, %c0_7] : memref<128x64xf32, #tpu.memory_space<vmem>>, vector<128x64xf32>
    %cst_8 = arith.constant dense<0.000000e+00> : vector<8x64xf32>
    %9 = tpu.matmul %7, %8, %cst_8 {dimension_numbers = #tpu.dot_dimension_numbers<[1], [0], [0], [1], [0, 0, 1, 1], [], []>} : vector<8x128xf32>, vector<128x64xf32>, vector<8x64xf32> -> vector<8x64xf32>
    %c0_9 = arith.constant 0 : index
    %c0_10 = arith.constant 0 : index
    %10 = vector.load %arg5[%c0_9, %c0_10] : memref<1x64xf32, #tpu.memory_space<vmem>>, vector<1x64xf32>
    %11 = vector.broadcast %10 : vector<1x64xf32> to vector<8x64xf32>
    %12 = arith.addf %9, %11 : vector<8x64xf32>
    %cst_11 = arith.constant 0.000000e+00 : f32
    %13 = vector.broadcast %cst_11 : f32 to vector<8x64xf32>
    %14 = arith.maximumf %12, %13 : vector<8x64xf32>
    %c0_12 = arith.constant 0 : index
    %c0_13 = arith.constant 0 : index
    %15 = vector.load %arg6[%c0_12, %c0_13] : memref<64x128xf32, #tpu.memory_space<vmem>>, vector<64x128xf32>
    %cst_14 = arith.constant dense<0.000000e+00> : vector<8x128xf32>
    %16 = tpu.matmul %14, %15, %cst_14 {dimension_numbers = #tpu.dot_dimension_numbers<[1], [0], [0], [1], [0, 0, 1, 1], [], []>} : vector<8x64xf32>, vector<64x128xf32>, vector<8x128xf32> -> vector<8x128xf32>
    %c0_15 = arith.constant 0 : index
    %c0_16 = arith.constant 0 : index
    %17 = vector.load %arg7[%c0_15, %c0_16] : memref<1x128xf32, #tpu.memory_space<vmem>>, vector<1x128xf32>
    %18 = vector.broadcast %17 : vector<1x128xf32> to vector<8x128xf32>
    %19 = arith.addf %16, %18 : vector<8x128xf32>
    %c0_17 = arith.constant 0 : index
    %c0_18 = arith.constant 0 : index
    %20 = vector.load %arg8[%c0_17, %c0_18] : memref<8x128xf32, #tpu.memory_space<vmem>>, vector<8x128xf32>
    tpu.vector_store %arg8[%c0_17, %c0_18], %19 {strides = array<i32>} : memref<8x128xf32, #tpu.memory_space<vmem>>, vector<8x128xf32>,
    return
  }
  func.func @transform_0(%arg0: i32) -> (i32, i32) {
    %c0_i32 = arith.constant 0 : i32
    %c0_i32_0 = arith.constant 0 : i32
    return %arg0, %c0_i32 : i32, i32
  }
  func.func @transform_1(%arg0: i32) -> (i32, i32) {
    %c0_i32 = arith.constant 0 : i32
    %c0_i32_0 = arith.constant 0 : i32
    %c0_i32_1 = arith.constant 0 : i32
    return %c0_i32, %c0_i32_0 : i32, i32
  }
  func.func @transform_2(%arg0: i32) -> (i32, i32) {
    %c0_i32 = arith.constant 0 : i32
    %c0_i32_0 = arith.constant 0 : i32
    %c0_i32_1 = arith.constant 0 : i32
    return %c0_i32, %c0_i32_0 : i32, i32
  }
  func.func @transform_3(%arg0: i32) -> (i32, i32) {
    %c0_i32 = arith.constant 0 : i32
    %c0_i32_0 = arith.constant 0 : i32
    %c0_i32_1 = arith.constant 0 : i32
    return %c0_i32, %c0_i32_0 : i32, i32
  }
  func.func @transform_4(%arg0: i32) -> (i32, i32) {
    %c0_i32 = arith.constant 0 : i32
    %c0_i32_0 = arith.constant 0 : i32
    %c0_i32_1 = arith.constant 0 : i32
    return %c0_i32, %c0_i32_0 : i32, i32
  }
  func.func @transform_5(%arg0: i32) -> (i32, i32) {
    %c0_i32 = arith.constant 0 : i32
    %c0_i32_0 = arith.constant 0 : i32
    %c0_i32_1 = arith.constant 0 : i32
    return %c0_i32, %c0_i32_0 : i32, i32
  }
  func.func @transform_6(%arg0: i32) -> (i32, i32) {
    %c0_i32 = arith.constant 0 : i32
    %c0_i32_0 = arith.constant 0 : i32
    %c0_i32_1 = arith.constant 0 : i32
    return %c0_i32, %c0_i32_0 : i32, i32
  }
  func.func @transform_7(%arg0: i32) -> (i32, i32) {
    %c0_i32 = arith.constant 0 : i32
    %c0_i32_0 = arith.constant 0 : i32
    return %arg0, %c0_i32 : i32, i32
  }
}

</mosaic_0001>

<bundles_post_ra>
// kernel: feedforward_nn.1
= control target key start
LH: loop header
LB: loop body
LE: loop exit
PB: predicated region body
PF: predicated region fallthrough
CT: control target
= control target key end

     0   :  { %v404_v0 = vmov 0.0   ;;  %vm405_vm0 = vmmov 0   ;;  %vm38_vm1 = vcmask 261120   ;;  %vm222_vm2 = vcmask 523264   ;;  %s579_s1 = inlined_call_operand.vmem [shape: f32[32,128], index: 1, kind: input, shape index: {}]   ;;  %s580_s3 = inlined_call_operand.vmem [shape: f32[128,64], index: 3, kind: input, shape index: {}]   ;;  %s581_s0 = inlined_call_operand.vmem [shape: f32[8,32], index: 0, kind: input, shape index: {}]   ;;  %s582_s5 = inlined_call_operand.vmem [shape: f32[64,128], index: 5, kind: input, shape index: {}]   ;;  %s583_s2 = inlined_call_operand.vmem [shape: f32[1,128], index: 2, kind: input, shape index: {}]   ;;  %s584_s4 = inlined_call_operand.vmem [shape: f32[1,64], index: 4, kind: input, shape index: {}]   ;;  %s585_s6 = inlined_call_operand.vmem [shape: f32[1,128], index: 6, kind: input, shape index: {}]   ;;  %s586_s7 = inlined_call_operand.vmem [shape: f32[8,128], index: 7, kind: output, shape index: {}]  }
   0x1   :  { %337 = vmatprep.subr.mxu0 %v404_v0  ;;  %v30_v1 = vld [vmem:[%s579_s1 + $0x18] sm:$0xff]  ;;  %v29_v2 = vld [vmem:[%s579_s1 + $0x10] sm:$0xff]  ;;  %345 = vmatprep.mubr.msk.f32.mxu0 %vm405_vm0, %v404_v0  ;;  %v28_v4 = vld [vmem:[%s579_s1 + $0x8] sm:$0xff] }
   0x2   :  { %338 = vmatpush3.msra.mxu0 %v30_v1  ;;  %348 = vmatprep.subr.mxu1 %v404_v0  ;;  %v128_v3 = vld [vmem:[%s580_s3 + $0x78] sm:$0xff]  ;;  %v127_v5 = vld [vmem:[%s580_s3 + $0x70] sm:$0xff]  ;;  %v126_v6 = vld [vmem:[%s580_s3 + $0x68] sm:$0xff] }
   0x3   :  { %339 = vmatprep.subr.mxu0 %v404_v0  ;;  %349 = vmatpush3.msra.mxu1 %v128_v3  ;;  %v27_v7 = vld [vmem:[%s579_s1] sm:$0xff]  ;;  %v124_v10 = vld [vmem:[%s580_s3 + $0x58] sm:$0xff]  ;;  %v123_v11 = vld [vmem:[%s580_s3 + $0x50] sm:$0xff] }
   0x4   :  { %340 = vmatpush3.msra.mxu0 %v29_v2  ;;  %350 = vmatprep.subr.mxu1 %v404_v0  ;;  %v26_v8 = vld [vmem:[%s581_s0] sm:$0xff]  ;;  %v122_v12 = vld [vmem:[%s580_s3 + $0x48] sm:$0xff]  ;;  %v120_v14 = vld [vmem:[%s580_s3 + $0x38] sm:$0xff] }
   0x5   :  { %341 = vmatprep.subr.mxu0 %v404_v0  ;;  %351 = vmatpush3.msra.mxu1 %v127_v5  ;;  %v125_v9 = vld [vmem:[%s580_s3 + $0x60] sm:$0xff]  ;;  %v119_v15 = vld [vmem:[%s580_s3 + $0x30] sm:$0xff]  ;;  %v118_v16 = vld [vmem:[%s580_s3 + $0x28] sm:$0xff] }
   0x6   :  { %342 = vmatpush3.msra.mxu0 %v28_v4  ;;  %352 = vmatprep.subr.mxu1 %v404_v0  ;;  %v121_v13 = vld [vmem:[%s580_s3 + $0x40] sm:$0xff]  ;;  %v116_v18 = vld [vmem:[%s580_s3 + $0x18] sm:$0xff]  ;;  %v115_v19 = vld [vmem:[%s580_s3 + $0x10] sm:$0xff] }
   0x7   :  { %343 = vmatprep.subr.mxu0 %v404_v0  ;;  %353 = vmatpush3.msra.mxu1 %v126_v6  ;;  %v117_v17 = vld [vmem:[%s580_s3 + $0x20] sm:$0xff]  ;;  %v114_v20 = vld [vmem:[%s580_s3 + $0x8] sm:$0xff]  ;;  %v214_v22 = vld [vmem:[%s582_s5 + $0x38] sm:$0xff] }
   0x8   :  { %344 = vmatpush3.msra.mxu0 %v27_v7  ;;  %354 = vmatprep.subr.mxu1 %v404_v0  ;;  %v113_v21 = vld [vmem:[%s580_s3] sm:$0xff]  ;;  %v213_v23 = vld [vmem:[%s582_s5 + $0x30] sm:$0xff]  ;;  %v212_v24 = vld [vmem:[%s582_s5 + $0x28] sm:$0xff] }
   0x9   :  { %346 = vmatmul.mubr.msk.f32.vlgmr.msra.gmra.mxu0 %vm38_vm1, %v26_v8  ;;  %355 = vmatpush3.msra.mxu1 %v125_v9  ;;  %v211_v25 = vld [vmem:[%s582_s5 + $0x20] sm:$0xff]  ;;  %v210_v26 = vld [vmem:[%s582_s5 + $0x18] sm:$0xff]  ;;  %v209_v32 = vld [vmem:[%s582_s5 + $0x10] sm:$0xff] }
   0xa   :  { %356 = vmatprep.subr.mxu1 %v404_v0  ;;  %380 = vmatprep.mubr.msk.f32.mxu1 %vm405_vm0, %v404_v0  ;;  %v301_v27 = vld [vmem:[%s583_s2] ss:$0 sm:$0xff]  ;;  %v208_v33 = vld [vmem:[%s582_s5 + $0x8] sm:$0xff] }
   0xb   :  { %357 = vmatpush3.msra.mxu1 %v124_v10  ;;  %383 = vmatprep.subr.mxu0 %v404_v0  ;;  %v207_v34 = vld [vmem:[%s582_s5] sm:$0xff] }
   0xc   :  { %358 = vmatprep.subr.mxu1 %v404_v0  ;;  %399 = vmatprep.mubr.msk.f32.mxu0 %vm405_vm0, %v404_v0  ;;  %v303_v35 = vld [vmem:[%s584_s4] ss:$0 sm:$0xff] }
   0xd   :  { %359 = vmatpush3.msra.mxu1 %v123_v11  ;;  %384 = vmatpush3.msra.mxu0 %v214_v22  ;;  %v304_v40 = vld [vmem:[%s585_s6] ss:$0 sm:$0xff] }
   0xe   :  { %360 = vmatprep.subr.mxu1 %v404_v0  ;;  %385 = vmatprep.subr.mxu0 %v404_v0 }
   0xf   :  { %361 = vmatpush3.msra.mxu1 %v122_v12  ;;  %386 = vmatpush3.msra.mxu0 %v213_v23 }
  0x10   :  { %362 = vmatprep.subr.mxu1 %v404_v0  ;;  %387 = vmatprep.subr.mxu0 %v404_v0 }
  0x11   :  { %363 = vmatpush3.msra.mxu1 %v121_v13  ;;  %388 = vmatpush3.msra.mxu0 %v212_v24 }
  0x12   :  { %364 = vmatprep.subr.mxu1 %v404_v0  ;;  %389 = vmatprep.subr.mxu0 %v404_v0 }
  0x13   :  { %365 = vmatpush3.msra.mxu1 %v120_v14  ;;  %390 = vmatpush3.msra.mxu0 %v211_v25 }
  0x14   :  { %366 = vmatprep.subr.mxu1 %v404_v0  ;;  %391 = vmatprep.subr.mxu0 %v404_v0 }
  0x15   :  { %367 = vmatpush3.msra.mxu1 %v119_v15  ;;  %392 = vmatpush3.msra.mxu0 %v210_v26 }
  0x16   :  { %368 = vmatprep.subr.mxu1 %v404_v0  ;;  %393 = vmatprep.subr.mxu0 %v404_v0 }
  0x17   :  { %369 = vmatpush3.msra.mxu1 %v118_v16  ;;  %394 = vmatpush3.msra.mxu0 %v209_v32 }
  0x18   :  { %370 = vmatprep.subr.mxu1 %v404_v0  ;;  %395 = vmatprep.subr.mxu0 %v404_v0 }
  0x19   :  { %371 = vmatpush3.msra.mxu1 %v117_v17  ;;  %396 = vmatpush3.msra.mxu0 %v208_v33 }
  0x1a   :  { %372 = vmatprep.subr.mxu1 %v404_v0  ;;  %397 = vmatprep.subr.mxu0 %v404_v0 }
  0x1b   :  { %373 = vmatpush3.msra.mxu1 %v116_v18  ;;  %398 = vmatpush3.msra.mxu0 %v207_v34 }
  0x1c   :  { %374 = vmatprep.subr.mxu1 %v404_v0 }
  0x1d   :  { %375 = vmatpush3.msra.mxu1 %v115_v19 }
  0x1e   :  { %376 = vmatprep.subr.mxu1 %v404_v0 }
  0x1f   :  { %377 = vmatpush3.msra.mxu1 %v114_v20 }
  0x20   :  { %378 = vmatprep.subr.mxu1 %v404_v0 }
  0x21   :  { %379 = vmatpush3.msra.mxu1 %v113_v21 }
  0xc9   :  { %v108_v28 = vpop.f32.mrf.mxu0 }
  0xca   :  { %v109_v29 = vadd.f32 %v301_v27, %v108_v28 }
  0xcb   :  { %v347_v30 = vpop.f32.mrf.mxu0 }
  0xcc   :  { %v112_v31 = vmax.f32 %v109_v29, 0.0 }
  0xce   :  { %381 = vmatmul.mubr.f32.vlgmr.msra.gmra.mxu1 %v112_v31 }
 0x18e   :  { %v202_v36 = vpop.f32.mrf.mxu1 }
 0x18f   :  { %v203_v37 = vadd.f32 %v303_v35, %v202_v36 }
 0x190   :  { %v382_v38 = vpop.f32.mrf.mxu1 }
 0x191   :  { %v206_v39 = vmax.f32 %v203_v37, 0.0 }
 0x193   :  { %400 = vmatmul.mubr.msk.f32.vlgmr.msra.gmra.mxu0 %vm222_vm2, %v206_v39 }
 0x253   :  { %v292_v41 = vpop.f32.mrf.mxu0 }
 0x254   :  { %v293_v42 = vadd.f32 %v304_v40, %v292_v41 }
 0x255   :  { %v401_v43 = vpop.f32.mrf.mxu0 }
 0x256   :  { %296 = vst [vmem:[%s586_s7] sm:$0xff] %v293_v42 }

</bundles_post_ra>
